<compile_context>
chip_gen: v7x
topology: tpu7x:2x2x1
jax: 0.10.0
libtpu: 0.0.40
codegen_flags: <defaults>
</compile_context>

<pallas_src>
import numpy as np
import jax
import jax.numpy as jnp
from jax.experimental import pallas as pl
from jax.experimental.pallas import tpu as pltpu

LANE = 128


# ----------------------------- fused kernel ----------------------------------


def _fused_kernel(xt_ref, w1_ref, b1_ref, wf_ref, bf_ref, at_ref, out_ref, acc_ref):
    """One grid step: compute s for a reduction tile of locations on the fly, then
    accumulate logits_tile += s_tile @ A^T_tile; sigmoid + store on the last step."""
    k = pl.program_id(1)

    @pl.when(k == 0)
    def _():
        acc_ref[...] = jnp.zeros_like(acc_ref)

    # s = final1(relu(h1(x))) for this reduction tile of locations.
    # Matmul inputs bf16 (MXU), f32 accumulation; bias add / relu in f32
    # (v5e has no bf16 VPU path).
    ht = jnp.dot(w1_ref[...], xt_ref[...], preferred_element_type=jnp.float32)   # (J, tk)
    ht = jnp.maximum(ht + b1_ref[...], 0.0)
    s = jnp.dot(wf_ref[...], ht.astype(wf_ref.dtype),
                preferred_element_type=jnp.float32)                               # (1, tk)
    s = s + bf_ref[0, 0]

    # Neighborhood (permutation) average, applied after final1 by linearity:
    # logits_tile += s_tile @ A^T[tile_k, tile_n]   (A^T tile is the dominant HBM stream)
    acc_ref[...] += jnp.dot(s.astype(at_ref.dtype), at_ref[...],
                            preferred_element_type=jnp.float32)

    @pl.when(k == pl.num_programs(1) - 1)
    def _():
        out_ref[...] = jax.nn.sigmoid(acc_ref[...])


# ----------------------------- setup helpers ---------------------------------


def _round_up(x, m):
    return ((x + m - 1) // m) * m


def _choose_tiles(L):
    """Pick (Lp, tile_n, tile_k). Small graphs: one grid step over the whole A^T.
    Large graphs: asymmetric tiles (big lane/output tile, moderate reduction tile) so the
    per-step A^T DMA is ~2 MiB while double-buffered VMEM stays ~4 MiB (fits v5e's 16 MiB
    default scoped VMEM and v7x's 64 MiB physical VMEM)."""
    lp128 = max(_round_up(L, LANE), LANE)
    if lp128 <= 2048:                      # whole A^T <= 8 MiB bf16 -> single step
        return lp128, lp128, lp128
    tile_n, tile_k = 2048, 512             # 2048*512*2 B = 2 MiB A^T per step
    return _round_up(L, tile_n), tile_n, tile_k


def build_normalized_adjacency(adjacency_lst):
    """Row-normalized adjacency over the neighborhood MULTISET (incl. self-loop).
    np.add.at keeps duplicate/self entries weighted by multiplicity, which is exactly the
    permutation-average semantics of forward_simple, and every row sums to 1 (required for
    folding the final1 bias through the average)."""
    L = len(adjacency_lst)
    A = np.zeros((L, L), dtype=np.float32)
    for l in range(L):
        nbrs = np.asarray(list(adjacency_lst[l]) + [l], dtype=np.int64)
        np.add.at(A[l], nbrs, np.float32(1.0 / len(nbrs)))
    return A


def prepare_ggcn1_params(W1, b1, Wf, bf, adjacency_lst,
                         compute_dtype=jnp.bfloat16, force_tiles=None):
    """One-time prep (hoisted out of the per-call path): transposes / casts / padded
    adjacency / tile choice. PyTorch param shapes: h1 (J, nfeat)/(J,), final1 (1, J)/(1,)."""
    L = len(adjacency_lst)
    if force_tiles is None:
        Lp, tile_n, tile_k = _choose_tiles(L)
    else:
        tile_n, tile_k = force_tiles
        Lp = max(_round_up(L, tile_n), tile_n)
        assert Lp % tile_k == 0 and tile_k % LANE == 0 and tile_n % LANE == 0

    A = build_normalized_adjacency(adjacency_lst)
    AT = np.zeros((Lp, Lp), dtype=np.float32)
    AT[:L, :L] = A.T
    # Load-bearing padding invariant: padded X columns produce NONZERO s
    # (= Wf @ relu(b1) + bf); they are harmless only because the corresponding
    # reduction rows of A^T are exactly zero.
    assert np.all(AT[L:, :] == 0.0), "padded A^T reduction rows must be zero"
    assert np.allclose(AT[:L, :L].sum(axis=0), 1.0, atol=1e-6), "A rows must sum to 1"

    J, F = int(np.shape(W1)[0]), int(np.shape(W1)[1])
    return dict(
        L=L, Lp=Lp, J=J, F=F, tile_n=tile_n, tile_k=tile_k,
        W1=jnp.asarray(W1, jnp.float32).astype(compute_dtype),     # (J, F)  bf16
        b1=jnp.asarray(b1, jnp.float32).reshape(J, 1),              # (J, 1)  f32
        Wf=jnp.asarray(Wf, jnp.float32).astype(compute_dtype),     # (1, J)  bf16
        bf=jnp.asarray(bf, jnp.float32).reshape(1, 1),              # (1, 1)  f32 (SMEM)
        AT=jnp.asarray(AT).astype(compute_dtype),                   # (Lp, Lp) bf16
    )


def make_ggcn1_forward_simple(params):
    """Returns a jitted fwd(X) -> yhat of shape (L,), matching GGCN1.forward_simple."""
    L, Lp, J, F = params["L"], params["Lp"], params["J"], params["F"]
    tile_n, tile_k = params["tile_n"], params["tile_k"]
    W1, b1, Wf, bf, AT = (params[k] for k in ("W1", "b1", "Wf", "bf", "AT"))
    cdt = W1.dtype

    fused_call = pl.pallas_call(
        _fused_kernel,
        out_shape=jax.ShapeDtypeStruct((1, Lp), jnp.float32),
        grid=(Lp // tile_n, Lp // tile_k),                          # (out cols, reduction)
        in_specs=[
            pl.BlockSpec((F, tile_k), lambda j, k: (0, k)),         # X^T reduction tile
            pl.BlockSpec((J, F), lambda j, k: (0, 0)),              # W1 (whole)
            pl.BlockSpec((J, 1), lambda j, k: (0, 0)),              # b1 (whole, f32)
            pl.BlockSpec((1, J), lambda j, k: (0, 0)),              # Wf (whole)
            pl.BlockSpec(memory_space=pltpu.MemorySpace.SMEM),      # bf scalar
            pl.BlockSpec((tile_k, tile_n), lambda j, k: (k, j)),    # A^T tile (main stream)
        ],
        out_specs=pl.BlockSpec((1, tile_n), lambda j, k: (0, j)),   # lane-dense logits row
        scratch_shapes=[pltpu.VMEM((1, tile_n), jnp.float32)],      # f32 accumulator
        compiler_params=pltpu.CompilerParams(
            dimension_semantics=("parallel", "arbitrary")),
    )

    def fwd(X):
        X = jnp.asarray(X, jnp.float32)
        xt = jnp.pad(X.T, ((0, 0), (0, Lp - L))).astype(cdt)        # (F, Lp), zero-pad cols
        y = fused_call(xt, W1, b1, Wf, bf, AT)                      # (1, Lp) f32
        return y[0, :L]

    return jax.jit(fwd)


# ----------------------------- demo / self-check ------------------------------


def _bf16(x):
    return np.asarray(
        jnp.asarray(np.asarray(x, np.float32)).astype(jnp.bfloat16).astype(jnp.float32))


if __name__ == "__main__":
    # Small shapes consistent with the module: L locations, nfeat features, J hidden.
    L, nfeat, J = 200, 8, 16

    key = jax.random.PRNGKey(0)
    k_x, k_w1, k_b1, k_wf, k_bf = jax.random.split(key, 5)

    X = jax.random.normal(k_x, (L, nfeat), dtype=jnp.float32)
    W1 = 0.2 * jax.random.normal(k_w1, (J, nfeat), dtype=jnp.float32)   # h1.weight
    b1 = 0.1 * jax.random.normal(k_b1, (J,), dtype=jnp.float32)         # h1.bias
    Wf = 0.2 * jax.random.normal(k_wf, (1, J), dtype=jnp.float32)       # final1.weight
    bf = 0.1 * jax.random.normal(k_bf, (1,), dtype=jnp.float32)         # final1.bias

    # Ring graph adjacency list (what would be passed to forward()).
    adjacency_lst = [[(l - 1) % L, (l + 1) % L] for l in range(L)]

    # Reference of forward_simple semantics, mirroring the kernel's mixed precision
    # (bf16 matmul inputs, f32 accumulation / bias / relu / sigmoid).
    A = build_normalized_adjacency(adjacency_lst)
    Xb, W1b, Wfb, Ab = _bf16(X), _bf16(W1), _bf16(Wf), _bf16(A)
    b1n = np.asarray(b1, np.float32)
    bfn = np.asarray(bf, np.float32)
    H = np.maximum(Xb @ W1b.T + b1n[None, :], 0.0)          # h() for every location
    s = _bf16(H) @ Wfb.T + bfn[0]                            # final1 before the average
    logits = Ab @ _bf16(s)                                   # neighborhood (permutation) mean
    ref = 1.0 / (1.0 + np.exp(-logits[:, 0]))

    # 1) Default path: small graph -> single grid step (whole A^T streamed once).
    params = prepare_ggcn1_params(W1, b1, Wf, bf, adjacency_lst,
                                  compute_dtype=jnp.bfloat16)
    fwd = make_ggcn1_forward_simple(params)
    yhat = jax.block_until_ready(fwd(X))
    np.testing.assert_allclose(np.asarray(yhat), ref, rtol=1e-3, atol=1e-3)

    # 2) Forced small tiles so the multi-step reduction / accumulator path is exercised
    #    at demo size (production sizes get this path automatically for Lp > 2048).
    params_t = prepare_ggcn1_params(W1, b1, Wf, bf, adjacency_lst,
                                    compute_dtype=jnp.bfloat16, force_tiles=(128, 128))
    fwd_t = make_ggcn1_forward_simple(params_t)
    yhat_t = jax.block_until_ready(fwd_t(X))
    np.testing.assert_allclose(np.asarray(yhat_t), ref, rtol=1e-3, atol=1e-3)

    print("KERNEL_OK")
</pallas_src>

<mosaic_0001>
module attributes {stable_mosaic.version = 11 : i64} {
  func.func @_fused_kernel(%arg0: i32, %arg1: i32, %arg2: memref<8x256xbf16, #tpu.memory_space<vmem>>, %arg3: memref<16x8xbf16, #tpu.memory_space<vmem>>, %arg4: memref<16x1xf32, #tpu.memory_space<vmem>>, %arg5: memref<1x16xbf16, #tpu.memory_space<vmem>>, %arg6: memref<1x1xf32, #tpu.memory_space<smem>>, %arg7: memref<256x256xbf16, #tpu.memory_space<vmem>>, %arg8: memref<1x256xf32, #tpu.memory_space<vmem>>, %arg9: memref<1x256xf32, #tpu.memory_space<vmem>>) attributes {dimension_semantics = [#tpu.dimension_semantics<parallel>, #tpu.dimension_semantics<arbitrary>], iteration_bounds = array<i64: 1, 1>, scalar_prefetch = 0 : i64, scratch_operands = 1 : i64, tpu.core_type = #tpu.core_type<tc>, window_params = [{transform_indices = @transform_0, window_bounds = array<i64: 8, 256>}, {pipeline_mode = #tpu.pipeline_mode<synchronous>, transform_indices = @transform_1, window_bounds = array<i64: 16, 8>}, {pipeline_mode = #tpu.pipeline_mode<synchronous>, transform_indices = @transform_2, window_bounds = array<i64: 16, 1>}, {pipeline_mode = #tpu.pipeline_mode<synchronous>, transform_indices = @transform_3, window_bounds = array<i64: 1, 16>}, {transform_indices = @transform_4, window_bounds = array<i64: 1, 1>}, {transform_indices = @transform_5, window_bounds = array<i64: 256, 256>}, {transform_indices = @transform_6, window_bounds = array<i64: 1, 256>}]} {
    %c0_i32 = arith.constant 0 : i32
    %0 = arith.cmpi eq, %arg1, %c0_i32 : i32
    %1 = arith.extui %0 : i1 to i32
    %c0_i32_0 = arith.constant 0 : i32
    %2 = arith.cmpi ne, %1, %c0_i32_0 : i32
    scf.if %2 {
      %cst_21 = arith.constant 0.000000e+00 : f32
      %26 = vector.broadcast %cst_21 : f32 to vector<1x256xf32>
      %c0_22 = arith.constant 0 : index
      %c0_23 = arith.constant 0 : index
      %27 = vector.load %arg9[%c0_22, %c0_23] : memref<1x256xf32, #tpu.memory_space<vmem>>, vector<1x256xf32>
      tpu.vector_store %arg9[%c0_22, %c0_23], %26 {strides = array<i32>} : memref<1x256xf32, #tpu.memory_space<vmem>>, vector<1x256xf32>,
    } else {
    }
    %c0 = arith.constant 0 : index
    %c0_1 = arith.constant 0 : index
    %3 = vector.load %arg3[%c0, %c0_1] : memref<16x8xbf16, #tpu.memory_space<vmem>>, vector<16x8xbf16>
    %c0_2 = arith.constant 0 : index
    %c0_3 = arith.constant 0 : index
    %4 = vector.load %arg2[%c0_2, %c0_3] : memref<8x256xbf16, #tpu.memory_space<vmem>>, vector<8x256xbf16>
    %cst = arith.constant dense<0.000000e+00> : vector<16x256xf32>
    %5 = tpu.matmul %3, %4, %cst {dimension_numbers = #tpu.dot_dimension_numbers<[1], [0], [0], [1], [0, 0, 1, 1], [], []>} : vector<16x8xbf16>, vector<8x256xbf16>, vector<16x256xf32> -> vector<16x256xf32>
    %c0_4 = arith.constant 0 : index
    %c0_5 = arith.constant 0 : index
    %6 = vector.load %arg4[%c0_4, %c0_5] : memref<16x1xf32, #tpu.memory_space<vmem>>, vector<16x1xf32>
    %7 = vector.broadcast %6 : vector<16x1xf32> to vector<16x256xf32>
    %8 = arith.addf %5, %7 : vector<16x256xf32>
    %cst_6 = arith.constant 0.000000e+00 : f32
    %9 = vector.broadcast %cst_6 : f32 to vector<16x256xf32>
    %10 = arith.maximumf %8, %9 : vector<16x256xf32>
    %c0_7 = arith.constant 0 : index
    %c0_8 = arith.constant 0 : index
    %11 = vector.load %arg5[%c0_7, %c0_8] : memref<1x16xbf16, #tpu.memory_space<vmem>>, vector<1x16xbf16>
    %12 = arith.truncf %10 : vector<16x256xf32> to vector<16x256xbf16>
    %cst_9 = arith.constant dense<0.000000e+00> : vector<1x256xf32>
    %13 = tpu.matmul %11, %12, %cst_9 {dimension_numbers = #tpu.dot_dimension_numbers<[1], [0], [0], [1], [0, 0, 1, 1], [], []>} : vector<1x16xbf16>, vector<16x256xbf16>, vector<1x256xf32> -> vector<1x256xf32>
    %c0_10 = arith.constant 0 : index
    %c0_11 = arith.constant 0 : index
    %14 = memref.load %arg6[%c0_10, %c0_11] : memref<1x1xf32, #tpu.memory_space<smem>>
    %15 = vector.broadcast %14 : f32 to vector<1x256xf32>
    %16 = arith.addf %13, %15 : vector<1x256xf32>
    %c0_12 = arith.constant 0 : index
    %c0_13 = arith.constant 0 : index
    %17 = vector.load %arg9[%c0_12, %c0_13] : memref<1x256xf32, #tpu.memory_space<vmem>>, vector<1x256xf32>
    %18 = arith.truncf %16 : vector<1x256xf32> to vector<1x256xbf16>
    %c0_14 = arith.constant 0 : index
    %c0_15 = arith.constant 0 : index
    %19 = vector.load %arg7[%c0_14, %c0_15] : memref<256x256xbf16, #tpu.memory_space<vmem>>, vector<256x256xbf16>
    %cst_16 = arith.constant dense<0.000000e+00> : vector<1x256xf32>
    %20 = tpu.matmul %18, %19, %cst_16 {dimension_numbers = #tpu.dot_dimension_numbers<[1], [0], [0], [1], [0, 0, 1, 1], [], []>} : vector<1x256xbf16>, vector<256x256xbf16>, vector<1x256xf32> -> vector<1x256xf32>
    %21 = arith.addf %17, %20 : vector<1x256xf32>
    %c0_17 = arith.constant 0 : index
    %c0_18 = arith.constant 0 : index
    %22 = vector.load %arg9[%c0_17, %c0_18] : memref<1x256xf32, #tpu.memory_space<vmem>>, vector<1x256xf32>
    tpu.vector_store %arg9[%c0_17, %c0_18], %21 {strides = array<i32>} : memref<1x256xf32, #tpu.memory_space<vmem>>, vector<1x256xf32>,
    %c0_i32_19 = arith.constant 0 : i32
    %23 = arith.cmpi eq, %arg1, %c0_i32_19 : i32
    %24 = arith.extui %23 : i1 to i32
    %c0_i32_20 = arith.constant 0 : i32
    %25 = arith.cmpi ne, %24, %c0_i32_20 : i32
    scf.if %25 {
      %c0_21 = arith.constant 0 : index
      %c0_22 = arith.constant 0 : index
      %26 = vector.load %arg9[%c0_21, %c0_22] : memref<1x256xf32, #tpu.memory_space<vmem>>, vector<1x256xf32>
      %27 = arith.negf %26 : vector<1x256xf32>
      %28 = math.exp %27 : vector<1x256xf32>
      %cst_23 = arith.constant 1.000000e+00 : f32
      %29 = vector.broadcast %cst_23 : f32 to vector<1x256xf32>
      %30 = arith.addf %29, %28 : vector<1x256xf32>
      %31 = arith.divf %29, %30 : vector<1x256xf32>
      %c0_24 = arith.constant 0 : index
      %c0_25 = arith.constant 0 : index
      %32 = vector.load %arg8[%c0_24, %c0_25] : memref<1x256xf32, #tpu.memory_space<vmem>>, vector<1x256xf32>
      tpu.vector_store %arg8[%c0_24, %c0_25], %31 {strides = array<i32>} : memref<1x256xf32, #tpu.memory_space<vmem>>, vector<1x256xf32>,
    } else {
    }
    return
  }
  func.func @transform_0(%arg0: i32, %arg1: i32) -> (i32, i32) {
    %c0_i32 = arith.constant 0 : i32
    %c0_i32_0 = arith.constant 0 : i32
    return %c0_i32, %arg1 : i32, i32
  }
  func.func @transform_1(%arg0: i32, %arg1: i32) -> (i32, i32) {
    %c0_i32 = arith.constant 0 : i32
    %c0_i32_0 = arith.constant 0 : i32
    %c0_i32_1 = arith.constant 0 : i32
    return %c0_i32, %c0_i32_0 : i32, i32
  }
  func.func @transform_2(%arg0: i32, %arg1: i32) -> (i32, i32) {
    %c0_i32 = arith.constant 0 : i32
    %c0_i32_0 = arith.constant 0 : i32
    %c0_i32_1 = arith.constant 0 : i32
    return %c0_i32, %c0_i32_0 : i32, i32
  }
  func.func @transform_3(%arg0: i32, %arg1: i32) -> (i32, i32) {
    %c0_i32 = arith.constant 0 : i32
    %c0_i32_0 = arith.constant 0 : i32
    %c0_i32_1 = arith.constant 0 : i32
    return %c0_i32, %c0_i32_0 : i32, i32
  }
  func.func @transform_4(%arg0: i32, %arg1: i32) -> (i32, i32) {
    %c0_i32 = arith.constant 0 : i32
    %c0_i32_0 = arith.constant 0 : i32
    %c0_i32_1 = arith.constant 0 : i32
    return %c0_i32, %c0_i32_0 : i32, i32
  }
  func.func @transform_5(%arg0: i32, %arg1: i32) -> (i32, i32) {
    %c0_i32 = arith.constant 0 : i32
    return %arg1, %arg0 : i32, i32
  }
  func.func @transform_6(%arg0: i32, %arg1: i32) -> (i32, i32) {
    %c0_i32 = arith.constant 0 : i32
    %c0_i32_0 = arith.constant 0 : i32
    return %c0_i32, %arg0 : i32, i32
  }
}

</mosaic_0001>

<bundles_post_ra>
// kernel: fwd.1
= control target key start
LH: loop header
LB: loop body
LE: loop exit
PB: predicated region body
PF: predicated region fallthrough
CT: control target
= control target key end

     0   :  { %vm64_vm0 = vcmask 1043456   ;;  %v576_v3 = vmov 0   ;;  %vm60_vm1 = vcmask 64512   ;;  %s751_s0 = inlined_call_operand.vmem [shape: bf16[8,256], index: 0, kind: input, shape index: {}]   ;;  %s752_s1 = inlined_call_operand.vmem [shape: bf16[16,8], index: 1, kind: input, shape index: {}]   ;;  %s753_s2 = inlined_call_operand.vmem [shape: f32[16,1], index: 2, kind: input, shape index: {}]   ;;  %s754_s3 = inlined_call_operand.vmem [shape: bf16[1,16], index: 3, kind: input, shape index: {}]   ;;  %s755_s4 = inlined_call_operand.<no memory space> [shape: f32[1,1], index: 4, kind: input, shape index: {}]   ;;  %s756_s5 = inlined_call_operand.vmem [shape: bf16[256,256], index: 5, kind: input, shape index: {}]   ;;  %s757_s6 = inlined_call_operand.hbm [shape: f32[1,256], index: 6, kind: output, shape index: {}]  }
   0x1   :  { %v37_v0 = vld [vmem:[%s751_s0] sm:$0xff]  ;;  %103 = vmatprep.mubr.bf16.mxu1 %v576_v3  ;;  %496 = vset.pattern.permute.xlu0 %v576_v3  ;;  %v39_v6 = vld [vmem:[%s753_s2 + $0x8] sm:$0xff] }
   0x2   :  { %v455_v1 = vcombine.high %v37_v0, %v37_v0  ;;  %v454_v2 = vcombine.low %v37_v0, %v37_v0  ;;  %v499_v4 = vld [vmem:[%s752_s1] sm:$0xff]  }
   0x3   :  { %v38_v5 = vld [vmem:[%s753_s2] sm:$0xff] }
   0x4   :  { %42 = vperm.xlu0 %496, %v38_v5   ;;  %456 = vmatprep.subr.msk.bf16.mxu1 %vm64_vm0, %v455_v1  ;;  %v66_v7 = vsel %vm64_vm0, %v454_v2, 0 }
   0x5   :  { %72 = vmatpush1.bf16.msra.mxu1 %v66_v7 }
   0x8   :  { %47 = vperm.xlu0 %496, %v39_v6   ;;  %457 = vmatmul.mubr.msk.bf16.vlgmr.msra.gmra.mrb[0].mxu1 %vm60_vm1, %v499_v4 }
   0x9   :  { %159 = vmatprep.mubr.bf16.mxu1 %v576_v3 }
   0xa   :  { %12 = vsyncpa [#allocation5], 0  ;;  %v500_v8 = vld [vmem:[%s756_s5 + $0x4] ss:$8 sps:$4 sm:$0xff]   ;;  %v502_v9 = vld [vmem:[%s756_s5] ss:$8 sps:$4 sm:$0xff]   ;;  %v122_v57 = vstv %s755_s4  ;;  %v30_v2 = vlaneseq }
   0xb   :  { %v503_v10 = vld [vmem:[%s756_s5 + $0x14] ss:$8 sps:$4 sm:$0xff]   ;;  %363 = vmatprep.subr.bf16.mxu0 %v500_v8  ;;  %v505_v11 = vld [vmem:[%s756_s5 + $0x10] ss:$8 sps:$4 sm:$0xff]   ;;  %v506_v12 = vld [vmem:[%s756_s5 + $0x24] ss:$8 sps:$4 sm:$0xff]  }
   0xc   :  { %364 = vmatpush1.bf16.msra.mxu0 %v502_v9  ;;  %v508_v13 = vld [vmem:[%s756_s5 + $0x20] ss:$8 sps:$4 sm:$0xff]   ;;  %v509_v14 = vld [vmem:[%s756_s5 + $0x34] ss:$8 sps:$4 sm:$0xff]   ;;  %v511_v15 = vld [vmem:[%s756_s5 + $0x30] ss:$8 sps:$4 sm:$0xff]  }
   0xd   :  { %365 = vmatprep.subr.bf16.mxu0 %v503_v10  ;;  %v512_v16 = vld [vmem:[%s756_s5 + $0x44] ss:$8 sps:$4 sm:$0xff]   ;;  %v514_v17 = vld [vmem:[%s756_s5 + $0x40] ss:$8 sps:$4 sm:$0xff]   ;;  %v515_v18 = vld [vmem:[%s756_s5 + $0x54] ss:$8 sps:$4 sm:$0xff]  }
   0xe   :  { %v517_v19 = vld [vmem:[%s756_s5 + $0x50] ss:$8 sps:$4 sm:$0xff]   ;;  %v518_v20 = vld [vmem:[%s756_s5 + $0x64] ss:$8 sps:$4 sm:$0xff]   ;;  %v520_v21 = vld [vmem:[%s756_s5 + $0x60] ss:$8 sps:$4 sm:$0xff]  }
   0xf   :  { %v521_v22 = vld [vmem:[%s756_s5 + $0x74] ss:$8 sps:$4 sm:$0xff]   ;;  %v523_v23 = vld [vmem:[%s756_s5 + $0x70] ss:$8 sps:$4 sm:$0xff]   ;;  %v524_v24 = vld [vmem:[%s756_s5 + $0x84] ss:$8 sps:$4 sm:$0xff]  }
  0x10   :  { %366 = vmatpush1.bf16.msra.mxu0 %v505_v11  ;;  %v526_v25 = vld [vmem:[%s756_s5 + $0x80] ss:$8 sps:$4 sm:$0xff]   ;;  %v527_v26 = vld [vmem:[%s756_s5 + $0x94] ss:$8 sps:$4 sm:$0xff]   ;;  %v529_v27 = vld [vmem:[%s756_s5 + $0x90] ss:$8 sps:$4 sm:$0xff]  }
  0x11   :  { %367 = vmatprep.subr.bf16.mxu0 %v506_v12  ;;  %v530_v28 = vld [vmem:[%s756_s5 + $0xa4] ss:$8 sps:$4 sm:$0xff]   ;;  %v532_v29 = vld [vmem:[%s756_s5 + $0xa0] ss:$8 sps:$4 sm:$0xff]   ;;  %v533_v30 = vld [vmem:[%s756_s5 + $0xb4] ss:$8 sps:$4 sm:$0xff]  }
  0x12   :  { %v535_v31 = vld [vmem:[%s756_s5 + $0xb0] ss:$8 sps:$4 sm:$0xff]   ;;  %v536_v32 = vld [vmem:[%s756_s5 + $0xc4] ss:$8 sps:$4 sm:$0xff]   ;;  %v538_v33 = vld [vmem:[%s756_s5 + $0xc0] ss:$8 sps:$4 sm:$0xff]  }
  0x13   :  { %v539_v34 = vld [vmem:[%s756_s5 + $0xd4] ss:$8 sps:$4 sm:$0xff]   ;;  %v541_v35 = vld [vmem:[%s756_s5 + $0xd0] ss:$8 sps:$4 sm:$0xff]   ;;  %v542_v36 = vld [vmem:[%s756_s5 + $0xe4] ss:$8 sps:$4 sm:$0xff]  }
  0x14   :  { %368 = vmatpush1.bf16.msra.mxu0 %v508_v13  ;;  %v118_v53 = vld [vmem:[%s754_s3] sm:$0x1]  ;;  %vm123_vm2 = vcmask 130048   ;;  %v545_v55 = vld [vmem:[%s756_s5 + $0xf4] ss:$8 sps:$4 sm:$0xff]   ;;  %vm729_vm3 = vcmp.lt.s32.totalorder %v30_v2, 256 }
  0x15   :  { %369 = vmatprep.subr.bf16.mxu0 %v509_v14  ;;  %v544_v54 = vld [vmem:[%s756_s5 + $0xe0] ss:$8 sps:$4 sm:$0xff]   ;;  %v547_v56 = vld [vmem:[%s756_s5 + $0xf0] ss:$8 sps:$4 sm:$0xff]   ;;  %v577_v4 = vmov 0.0   ;;  %v411_v8 = vshrl.u32 %v30_v2, 7 }
  0x16   :  { %34 = vst.msk [vmem:[#allocation2] sm:$0x3] %vm729_vm3, %v577_v4  ;;  %v578_v5 = vmov 1966171168   ;;  %s579_s3 = smov [#allocation4]  }
  0x17   :  { %v408_v6 = vunpack.c.l.s4 %v578_v5  ;;  %s445_s4 = sshll.u32 %s579_s3, 4  ;;  %s446_s4 = int_to_ptr.vmem [resolvable:$true] %s445_s4 }
  0x18   :  { %370 = vmatpush1.bf16.msra.mxu0 %v511_v15  ;;  %s552_s5 = scalar_lea.vmem %s446_s4, 32  ;;  %p557_p1 = scmp.lt.s32.totalorder %s446_s4, %s446_s4 }
  0x19   :  { %371 = vmatprep.subr.bf16.mxu0 %v512_v16  ;;  %v409_v7 = vunpack.c.0.s8 %v408_v6  ;;  %p553_p0 = scmp.ne.s32.totalorder %s446_s4, %s552_s5  ;;  %p558_p2 = scmp.lt.s32.totalorder %s552_s5, %s552_s5 }
  0x1b   :  { %v412_v10 = vsub.s32 %v409_v7, %v411_v8  ;;  %p559_p3 = por %p558_p2, %p557_p1 }
  0x1c   :  { %372 = vmatpush1.bf16.msra.mxu0 %v514_v17 }
  0x1d   :  { %373 = vmatprep.subr.bf16.mxu0 %v515_v18  ;;  %v168_v16 = vld [vmem:[#allocation2] sm:$0x3]  ;;  %p560_p4 = pnand %p559_p3, %p553_p0 }
  0x20   :  { %374 = vmatpush1.bf16.msra.mxu0 %v517_v19 }
  0x21   :  { %375 = vmatprep.subr.bf16.mxu0 %v518_v20 }
  0x24   :  { %376 = vmatpush1.bf16.msra.mxu0 %v520_v21 }
  0x25   :  { %377 = vmatprep.subr.bf16.mxu0 %v521_v22 }
  0x28   :  { %378 = vmatpush1.bf16.msra.mxu0 %v523_v23 }
  0x29   :  { %379 = vmatprep.subr.bf16.mxu0 %v524_v24 }
  0x2c   :  { %380 = vmatpush1.bf16.msra.mxu0 %v526_v25 }
  0x2d   :  { %381 = vmatprep.subr.bf16.mxu0 %v527_v26 }
  0x30   :  { %382 = vmatpush1.bf16.msra.mxu0 %v529_v27 }
  0x31   :  { %383 = vmatprep.subr.bf16.mxu0 %v530_v28 }
  0x34   :  { %384 = vmatpush1.bf16.msra.mxu0 %v532_v29 }
  0x35   :  { %385 = vmatprep.subr.bf16.mxu0 %v533_v30 }
  0x38   :  { %386 = vmatpush1.bf16.msra.mxu0 %v535_v31 }
  0x39   :  { %387 = vmatprep.subr.bf16.mxu0 %v536_v32 }
  0x3c   :  { %388 = vmatpush1.bf16.msra.mxu0 %v538_v33 }
  0x3d   :  { %389 = vmatprep.subr.bf16.mxu0 %v539_v34 }
  0x40   :  { %390 = vmatpush1.bf16.msra.mxu0 %v541_v35 }
  0x41   :  { %391 = vmatprep.subr.bf16.mxu0 %v542_v36 }
  0x44   :  { %392 = vmatpush1.bf16.msra.mxu0 %v544_v54 }
  0x45   :  { %393 = vmatprep.subr.bf16.mxu0 %v545_v55 }
  0x48   :  { %394 = vmatpush1.bf16.msra.mxu0 %v547_v56 }
  0x83   :  { %v43_v37 = vpop.permute.xlu0 %42 }
  0x87   :  { %v48_v41 = vpop.permute.xlu0 %47 }
  0xdb   :  { %v105_v38 = vpop.f32.mrb[0].mxu1 }
  0xdc   :  { %v106_v39 = vadd.f32 %v105_v38, %v43_v37  ;;  %v107_v40 = vpop.f32.mrb[1].mxu1 }
  0xdd   :  { %v108_v42 = vadd.f32 %v107_v40, %v43_v37  ;;  %v109_v43 = vpop.f32.mrb[2].mxu1 }
  0xde   :  { %v110_v44 = vadd.f32 %v109_v43, %v48_v41  ;;  %v111_v45 = vpop.f32.mrb[3].mxu1  ;;  %v114_v47 = vmax.f32 %v106_v39, 0.0 }
  0xdf   :  { %v112_v46 = vadd.f32 %v111_v45, %v48_v41  ;;  %v115_v49 = vmax.f32 %v108_v42, 0.0 }
  0xe0   :  { %v116_v48 = vmax.f32 %v110_v44, 0.0 }
  0xe1   :  { %v117_v50 = vmax.f32 %v112_v46, 0.0 }
  0xe2   :  { %v119_v51 = vpack.c.bf16 %v116_v48, %v114_v47 }
  0xe3   :  { %v120_v52 = vpack.c.bf16 %v117_v50, %v115_v49 }
  0xe5   :  { %127 = vmatprep.subr.bf16.mxu1 %v120_v52 }
  0xe6   :  { %128 = vmatpush1.bf16.msra.mxu1 %v119_v51 }
  0xe9   :  { %458 = vmatmul.mubr.msk.bf16.vlgmr.msra.gmra.mrb[4].mxu1 %vm123_vm2, %v118_v53 }
 0x1bc   :  { %v161_v58 = vpop.f32.mrb[4].mxu1 }
 0x1bd   :  { %v162_v59 = vadd.f32 %v161_v58, %v122_v57  ;;  %v163_v60 = vpop.f32.mrb[5].mxu1 }
 0x1be   :  { %v165_v61 = vpop.f32.mrb[6].mxu1  ;;  %v164_v62 = vadd.f32 %v163_v60, %v122_v57 }
 0x1bf   :  { %v166_v63 = vpop.f32.mrb[7].mxu1  ;;  %v169_v1 = vpack.c.bf16 %v162_v59, %v162_v59 }
 0x1c0   :  { %v170_v0 = vpack.c.bf16 %v164_v62, %v164_v62 }
 0x1c2   :  { %395 = vmatprep.mubr.bf16.mxu0 %v170_v0 }
 0x1c3   :  { %396 = vmatmul.mubr.bf16.vlgmr.msra.gmra.mrb[0].mxu0 %v169_v1 }
 0x296   :  { %v397_v9 = vpop.f32.mrb[0].mxu0 }
 0x297   :  { %v399_v11 = vpop.f32.mrb[1].mxu0 }
 0x298   :  { %v406_v12 = vcombine.low %v397_v9, %v399_v11  ;;  %v401_v13 = vpop.f32.mrb[2].mxu0 }
 0x299   :  { %v402_v14 = vpop.f32.mrb[3].mxu0 }
 0x29a   :  { %v413_v15 = vrot.slane %v406_v12, %v412_v10 }
 0x29c   :  { %v420_v17 = vrot.slane %v413_v15, %v412_v10 }
 0x29e   :  { %v422_v18 = vadd.f32 %v420_v17, %v168_v16 }
 0x2a0   :  { %427 = vst.msk [vmem:[#allocation2] sm:$0x3] %vm729_vm3, %v422_v18 }
 0x2a7   :  { %v431_v19 = vld [vmem:[#allocation2] sm:$0x3] }
 0x2a8   :  { %v491_v20 = vmul.f32 -1.442695, %v431_v19 }
 0x2aa   :  { %548 = vpow2.f32 %v491_v20 }
 0x2b4   :  { %v549_v21 = vpop.eup %548 }
 0x2b5   :  { %v435_v22 = vadd.f32 1.0, %v549_v21 }
 0x2b7   :  { %550 = vrcp.f32 %v435_v22 }
 0x2c1   :  { %v551_v23 = vpop.eup %550 }
 0x2c2   :  { %438 = vst.msk [vmem:[#allocation4] sm:$0x3] %vm729_vm3, %v551_v23 }
 0x2c3   :  { %563 = shalt.err (!%p560_p4)
}
 0x2c4   :  { %s564_s18 = scalar_lea.hbm %s757_s6, 32 }
 0x2c5   :  { %p565_p5 = scmp.ne.s32.totalorder %s757_s6, %s564_s18  ;;  %p568_p6 = scmp.lt.u32.totalorder %s564_s18, %s757_s6 }
 0x2c7   :  { %p570_p7 = pnand %p568_p6, %p565_p5 }
 0x2c9   :  { %573 = shalt.err (!%p570_p7)
}
 0x2ca   :  { %448 = dma.vmem_to_hbm [thread:$0]  %s446_s4, 32, %s757_s6, [#allocation5]  }
 0x2cb   :  { %574 = dma.done.wait [#allocation5], 32  }
 0x2cc   :  { %575 = vsyncadd [#allocation5], 4294967264 }
 0x2cd   :  { %452 = vsyncpa [#allocation5], 1 }

</bundles_post_ra>
